<compile_context>
chip_gen: v7x
topology: tpu7x:2x2x1
jax: 0.10.0
libtpu: 0.0.40
codegen_flags: <defaults>
</compile_context>

<pallas_src>
import jax
import jax.numpy as jnp
from jax.experimental import pallas as pl
from jax.experimental.pallas import tpu as pltpu


def _round_up(a, m):
    return ((a + m - 1) // m) * m


# ----------------------------------------------------------------------------
# Kernel factory (B, num_tiles, dtypes and the scatter mode are static).
# ----------------------------------------------------------------------------
def _make_kernel(B, num_tiles, compute_dtype, use_mxu_scatter):
    f32 = jnp.float32

    def segment_sum(ids, feat, acc_ref):
        """acc[b] += sum_{rows r in tile : ids[r]==b} feat[r]   (exact in f32)."""
        if use_mxu_scatter:
            # ids: [1, T] int32 -> one-hot [B, T] built in-register, fed to MXU.
            iota = jax.lax.broadcasted_iota(jnp.int32, (B, ids.shape[1]), 0)
            onehot = (ids == iota).astype(compute_dtype)       # exact 0/1 values
            acc_ref[...] += jnp.dot(onehot, feat.astype(compute_dtype),
                                    preferred_element_type=f32)
        else:
            # ids: [T, 1] int32; tiny B -> VPU masked reduce, MXU stays free.
            parts = []
            for b in range(B):                                  # B is static & small
                m = (ids == b).astype(f32)                      # [T, 1]
                parts.append(jnp.sum(feat * m, axis=0, keepdims=True))  # [1, D]
            acc_ref[...] += jnp.concatenate(parts, axis=0)      # [B, D]

    def kernel(nid_ref, x_ref, eid_ref, ea_ref, u_ref,
               w1_ref, b1_ref, w2_ref, b2_ref, w3_ref, b3_ref,
               out_ref, acc_node_ref, acc_edge_ref):
        step = pl.program_id(0)

        @pl.when(step == 0)
        def _init():
            acc_node_ref[...] = jnp.zeros_like(acc_node_ref)
            acc_edge_ref[...] = jnp.zeros_like(acc_edge_ref)

        # Streaming scatter-adds over this node/edge tile (f32 accumulation).
        segment_sum(nid_ref[...], x_ref[...].astype(f32), acc_node_ref)
        segment_sum(eid_ref[...], ea_ref[...].astype(f32), acc_edge_ref)

        # MLP only once, on the final reduction step.
        @pl.when(step == num_tiles - 1)
        def _mlp():
            cat = jnp.concatenate(
                [acc_node_ref[...], acc_edge_ref[...], u_ref[...].astype(f32)],
                axis=-1)                                        # [B, Dn+De+Dg]
            h = jnp.dot(cat.astype(compute_dtype), w1_ref[...],
                        preferred_element_type=f32) + b1_ref[...]
            h = jnp.maximum(h, 0.0)                             # ReLU (f32 on VPU)
            h = jnp.dot(h.astype(compute_dtype), w2_ref[...],
                        preferred_element_type=f32) + b2_ref[...]
            h = jnp.maximum(h, 0.0)
            out = jnp.dot(h.astype(compute_dtype), w3_ref[...],
                          preferred_element_type=f32) + b3_ref[...]
            out_ref[...] = out.astype(out_ref.dtype)

    return kernel


# ----------------------------------------------------------------------------
# Wrapper: padding / layout plumbing + pallas_call.
# ----------------------------------------------------------------------------
def global_model_forward(x, edge_index, edge_attr, u, batch, params, *,
                         compute_dtype=jnp.bfloat16,
                         tile_rows=1024,
                         vpu_scatter_max_b=8,
                         force_mxu_scatter=False):
    f32 = jnp.float32
    N, Dn = x.shape
    E, De = edge_attr.shape
    B, Dg = u.shape
    w1, b1, w2, b2, w3, b3 = params
    mlp_in, H = w1.shape
    Do = w3.shape[1]
    assert mlp_in == Dn + De + Dg

    col = edge_index[1]                      # `row` unused, as in the PyTorch module
    edge_gid = batch[col]                    # graph id of each edge's target node

    use_mxu_scatter = bool(force_mxu_scatter or B > vpu_scatter_max_b)
    row_align = 128 if use_mxu_scatter else 8

    # Single reduction grid over node/edge tiles of (at most) tile_rows rows.
    num_tiles = max(1, pl.cdiv(N, tile_rows), pl.cdiv(E, tile_rows))
    tile_n = _round_up(max(1, pl.cdiv(N, num_tiles)), row_align)
    tile_e = _round_up(max(1, pl.cdiv(E, num_tiles)), row_align)
    N_pad = tile_n * num_tiles
    E_pad = tile_e * num_tiles

    # Lane-dense MLP dims (exact zero-padding).
    Hp = _round_up(H, 128)
    Dop = _round_up(Do, 128)

    def pad_rows(a, n_pad):
        return jnp.zeros((n_pad, a.shape[1]), a.dtype).at[:a.shape[0]].set(a)

    def pad_ids(ids, n_pad):
        # Sentinel id == B matches no graph -> padded rows contribute nothing.
        return jnp.full((n_pad,), B, jnp.int32).at[:ids.shape[0]].set(
            ids.astype(jnp.int32))

    def pad2(a, r, c, dtype):
        return jnp.zeros((r, c), dtype).at[:a.shape[0], :a.shape[1]].set(
            a.astype(dtype))

    x_p = pad_rows(x.astype(f32), N_pad)
    ea_p = pad_rows(edge_attr.astype(f32), E_pad)
    nid = pad_ids(batch, N_pad)
    eid = pad_ids(edge_gid, E_pad)

    if use_mxu_scatter:
        nid = nid.reshape(1, N_pad)
        eid = eid.reshape(1, E_pad)
        nid_spec = pl.BlockSpec((1, tile_n), lambda i: (0, i))
        eid_spec = pl.BlockSpec((1, tile_e), lambda i: (0, i))
    else:
        nid = nid.reshape(N_pad, 1)
        eid = eid.reshape(E_pad, 1)
        nid_spec = pl.BlockSpec((tile_n, 1), lambda i: (i, 0))
        eid_spec = pl.BlockSpec((tile_e, 1), lambda i: (i, 0))

    # Weights in the MXU compute dtype; biases stay f32 (added post-accumulation).
    w1p = pad2(w1, mlp_in, Hp, compute_dtype)
    w2p = pad2(w2, Hp, Hp, compute_dtype)
    w3p = pad2(w3, Hp, Dop, compute_dtype)
    b1p = pad2(b1.reshape(1, -1), 1, Hp, f32)
    b2p = pad2(b2.reshape(1, -1), 1, Hp, f32)
    b3p = pad2(b3.reshape(1, -1), 1, Dop, f32)
    u_f32 = u.astype(f32)

    const = lambda i: (0, 0)
    in_specs = [
        nid_spec,
        pl.BlockSpec((tile_n, Dn), lambda i: (i, 0)),
        eid_spec,
        pl.BlockSpec((tile_e, De), lambda i: (i, 0)),
        pl.BlockSpec((B, Dg), const),
        pl.BlockSpec((mlp_in, Hp), const),
        pl.BlockSpec((1, Hp), const),
        pl.BlockSpec((Hp, Hp), const),
        pl.BlockSpec((1, Hp), const),
        pl.BlockSpec((Hp, Dop), const),
        pl.BlockSpec((1, Dop), const),
    ]
    out_spec = pl.BlockSpec((B, Dop), const)

    cd_bytes = jnp.dtype(compute_dtype).itemsize
    flops = (2 * (N_pad * Dn + E_pad * De) * (B if use_mxu_scatter else 1)
             + 2 * B * (mlp_in * Hp + Hp * Hp + Hp * Dop))
    bytes_accessed = (4 * (N_pad * (Dn + 1) + E_pad * (De + 1))
                      + cd_bytes * (mlp_in * Hp + Hp * Hp + Hp * Dop)
                      + 4 * (2 * Hp + Dop + B * (Dg + Dop)))
    cost = pl.CostEstimate(flops=int(flops), transcendentals=0,
                           bytes_accessed=int(bytes_accessed))

    # Explicit VMEM budget (sized to fit v7x's 64 MiB physical / 32 MiB scoped).
    est_bytes = (2 * 4 * (tile_n * Dn + tile_e * De)                 # dbl-buffered feature tiles
                 + 2 * 4 * 128 * (pl.cdiv(tile_n, 8) + pl.cdiv(tile_e, 8))  # id tiles (layout pad)
                 + cd_bytes * (mlp_in * Hp + Hp * Hp + Hp * Dop)     # resident weights
                 + 4 * (B * (Dn + De + Dg + Dop) + 2 * Hp + Dop))    # u, biases, accs, out
    vmem_limit = int(min(32 * 1024 * 1024, max(16 * 1024 * 1024, 2 * est_bytes)))

    grid_spec = pltpu.PrefetchScalarGridSpec(
        num_scalar_prefetch=0,
        grid=(num_tiles,),
        in_specs=in_specs,
        out_specs=out_spec,
        scratch_shapes=[pltpu.VMEM((B, Dn), f32),      # agg_node accumulator
                        pltpu.VMEM((B, De), f32)],     # agg_edge accumulator
    )

    kernel = _make_kernel(B, num_tiles, compute_dtype, use_mxu_scatter)

    out_pad = pl.pallas_call(
        kernel,
        out_shape=jax.ShapeDtypeStruct((B, Dop), f32),
        grid_spec=grid_spec,
        compiler_params=pltpu.CompilerParams(
            dimension_semantics=("arbitrary",),        # pure reduction axis
            vmem_limit_bytes=vmem_limit),
        cost_estimate=cost,
    )(nid, x_p, eid, ea_p, u_f32, w1p, b1p, w2p, b2p, w3p, b3p)

    return out_pad[:, :Do]


# ----------------------------------------------------------------------------
# Deterministic parameter init (PyTorch nn.Linear-style uniform bounds).
# ----------------------------------------------------------------------------
def init_params(key, node_in, edge_in, global_in, hidden, out_size):
    mlp_in = node_in + edge_in + global_in

    def linear(k, fan_in, fan_out):
        kw, kb = jax.random.split(k)
        bound = 1.0 / jnp.sqrt(fan_in)
        w = jax.random.uniform(kw, (fan_in, fan_out), jnp.float32, -bound, bound)
        b = jax.random.uniform(kb, (fan_out,), jnp.float32, -bound, bound)
        return w, b

    k1, k2, k3 = jax.random.split(key, 3)
    w1, b1 = linear(k1, mlp_in, hidden)
    w2, b2 = linear(k2, hidden, hidden)
    w3, b3 = linear(k3, hidden, out_size)
    return (w1, b1, w2, b2, w3, b3)


# ----------------------------------------------------------------------------
# Pure-JAX reference (mirrors the PyTorch forward).
# ----------------------------------------------------------------------------
def reference_forward(x, edge_index, edge_attr, u, batch, params):
    B = u.shape[0]
    N = x.shape[0]
    col = edge_index[1]
    agg_node = jnp.zeros((B, x.shape[1]), jnp.float32).at[batch].add(x)
    per_node = jnp.zeros((N, edge_attr.shape[1]), jnp.float32).at[col].add(edge_attr)
    agg_edge = jnp.zeros((B, edge_attr.shape[1]), jnp.float32).at[batch].add(per_node)
    cat = jnp.concatenate([agg_node, agg_edge, u], axis=-1)
    w1, b1, w2, b2, w3, b3 = params
    h = jnp.maximum(cat @ w1 + b1, 0.0)
    h = jnp.maximum(h @ w2 + b2, 0.0)
    return h @ w3 + b3


if __name__ == "__main__":
    # Small synthetic batch of graphs: 2 graphs, 8 nodes, 12 edges.
    node_in, edge_in, global_in = 12, 10, 6
    hidden, out_size = 32, 16
    B, N, E = 2, 8, 12

    key = jax.random.PRNGKey(0)
    kx, ke, ku, kidx, kp = jax.random.split(key, 5)

    x = jax.random.normal(kx, (N, node_in), jnp.float32)
    edge_attr = jax.random.normal(ke, (E, edge_in), jnp.float32)
    u = jax.random.normal(ku, (B, global_in), jnp.float32)
    batch = jnp.array([0, 0, 0, 0, 1, 1, 1, 1], dtype=jnp.int32)   # node -> graph id
    src = jax.random.randint(kidx, (E,), 0, 4, jnp.int32)
    dst = jax.random.randint(jax.random.fold_in(kidx, 1), (E,), 0, 4, jnp.int32)
    offset = jnp.concatenate([jnp.zeros(E // 2, jnp.int32),
                              jnp.full(E // 2, 4, jnp.int32)])
    edge_index = jnp.stack([src + offset, dst + offset], axis=0)   # [2, E]

    params = init_params(kp, node_in, edge_in, global_in, hidden, out_size)
    ref = reference_forward(x, edge_index, edge_attr, u, batch, params)

    # 1) Default config: bf16 MXU inputs for the MLP, f32 VPU masked-reduce
    #    scatter; tile_rows=8 forces a multi-step reduction grid on this toy.
    out = global_model_forward(x, edge_index, edge_attr, u, batch, params,
                               compute_dtype=jnp.bfloat16, tile_rows=8)
    out = jax.block_until_ready(out)
    assert out.shape == (B, out_size)
    assert jnp.allclose(out, ref, atol=3e-2, rtol=3e-2), "bf16 path mismatch"

    # 2) Full-f32 config: tight check of the tiled/accumulator structure.
    out_f32 = jax.block_until_ready(
        global_model_forward(x, edge_index, edge_attr, u, batch, params,
                             compute_dtype=jnp.float32, tile_rows=8))
    assert jnp.allclose(out_f32, ref, atol=1e-4, rtol=1e-4), "f32 path mismatch"

    # 3) Force the in-kernel one-hot MXU scatter path (used when B is large).
    out_mxu = jax.block_until_ready(
        global_model_forward(x, edge_index, edge_attr, u, batch, params,
                             compute_dtype=jnp.float32, tile_rows=8,
                             force_mxu_scatter=True))
    assert jnp.allclose(out_mxu, ref, atol=1e-4, rtol=1e-4), "MXU scatter mismatch"

    print("KERNEL_OK")
</pallas_src>

<mosaic_0001>
module attributes {stable_mosaic.version = 11 : i64} {
  func.func @kernel(%arg0: i32, %arg1: memref<8x1xi32, #tpu.memory_space<vmem>>, %arg2: memref<8x12xf32, #tpu.memory_space<vmem>>, %arg3: memref<8x1xi32, #tpu.memory_space<vmem>>, %arg4: memref<8x10xf32, #tpu.memory_space<vmem>>, %arg5: memref<2x6xf32, #tpu.memory_space<vmem>>, %arg6: memref<28x128xbf16, #tpu.memory_space<vmem>>, %arg7: memref<1x128xf32, #tpu.memory_space<vmem>>, %arg8: memref<128x128xbf16, #tpu.memory_space<vmem>>, %arg9: memref<1x128xf32, #tpu.memory_space<vmem>>, %arg10: memref<128x128xbf16, #tpu.memory_space<vmem>>, %arg11: memref<1x128xf32, #tpu.memory_space<vmem>>, %arg12: memref<2x128xf32, #tpu.memory_space<vmem>>, %arg13: memref<2x12xf32, #tpu.memory_space<vmem>>, %arg14: memref<2x10xf32, #tpu.memory_space<vmem>>) attributes {dimension_semantics = [#tpu.dimension_semantics<arbitrary>], iteration_bounds = array<i64: 2>, scalar_prefetch = 0 : i64, scratch_operands = 2 : i64, tpu.core_type = #tpu.core_type<tc>, window_params = [{transform_indices = @transform_0, window_bounds = array<i64: 8, 1>}, {transform_indices = @transform_1, window_bounds = array<i64: 8, 12>}, {transform_indices = @transform_2, window_bounds = array<i64: 8, 1>}, {transform_indices = @transform_3, window_bounds = array<i64: 8, 10>}, {pipeline_mode = #tpu.pipeline_mode<synchronous>, transform_indices = @transform_4, window_bounds = array<i64: 2, 6>}, {pipeline_mode = #tpu.pipeline_mode<synchronous>, transform_indices = @transform_5, window_bounds = array<i64: 28, 128>}, {pipeline_mode = #tpu.pipeline_mode<synchronous>, transform_indices = @transform_6, window_bounds = array<i64: 1, 128>}, {pipeline_mode = #tpu.pipeline_mode<synchronous>, transform_indices = @transform_7, window_bounds = array<i64: 128, 128>}, {pipeline_mode = #tpu.pipeline_mode<synchronous>, transform_indices = @transform_8, window_bounds = array<i64: 1, 128>}, {pipeline_mode = #tpu.pipeline_mode<synchronous>, transform_indices = @transform_9, window_bounds = array<i64: 128, 128>}, {pipeline_mode = #tpu.pipeline_mode<synchronous>, transform_indices = @transform_10, window_bounds = array<i64: 1, 128>}, {pipeline_mode = #tpu.pipeline_mode<synchronous>, transform_indices = @transform_11, window_bounds = array<i64: 2, 128>}]} {
    %c0_i32 = arith.constant 0 : i32
    %0 = arith.cmpi eq, %arg0, %c0_i32 : i32
    %1 = arith.extui %0 : i1 to i32
    %c0_i32_0 = arith.constant 0 : i32
    %2 = arith.cmpi ne, %1, %c0_i32_0 : i32
    scf.if %2 {
      %cst_24 = arith.constant 0.000000e+00 : f32
      %50 = vector.broadcast %cst_24 : f32 to vector<2x12xf32>
      %c0_25 = arith.constant 0 : index
      %c0_26 = arith.constant 0 : index
      %51 = vector.load %arg13[%c0_25, %c0_26] : memref<2x12xf32, #tpu.memory_space<vmem>>, vector<2x12xf32>
      tpu.vector_store %arg13[%c0_25, %c0_26], %50 {strides = array<i32>} : memref<2x12xf32, #tpu.memory_space<vmem>>, vector<2x12xf32>,
      %cst_27 = arith.constant 0.000000e+00 : f32
      %52 = vector.broadcast %cst_27 : f32 to vector<2x10xf32>
      %c0_28 = arith.constant 0 : index
      %c0_29 = arith.constant 0 : index
      %53 = vector.load %arg14[%c0_28, %c0_29] : memref<2x10xf32, #tpu.memory_space<vmem>>, vector<2x10xf32>
      tpu.vector_store %arg14[%c0_28, %c0_29], %52 {strides = array<i32>} : memref<2x10xf32, #tpu.memory_space<vmem>>, vector<2x10xf32>,
    } else {
    }
    %c0 = arith.constant 0 : index
    %c0_1 = arith.constant 0 : index
    %3 = vector.load %arg1[%c0, %c0_1] : memref<8x1xi32, #tpu.memory_space<vmem>>, vector<8x1xi32>
    %c0_2 = arith.constant 0 : index
    %c0_3 = arith.constant 0 : index
    %4 = vector.load %arg2[%c0_2, %c0_3] : memref<8x12xf32, #tpu.memory_space<vmem>>, vector<8x12xf32>
    %c0_i32_4 = arith.constant 0 : i32
    %5 = vector.broadcast %c0_i32_4 : i32 to vector<8x1xi32>
    %6 = arith.cmpi eq, %3, %5 : vector<8x1xi32>
    %7 = arith.extui %6 : vector<8x1xi1> to vector<8x1xi32>
    %8 = arith.sitofp %7 : vector<8x1xi32> to vector<8x1xf32>
    %9 = vector.broadcast %8 : vector<8x1xf32> to vector<8x12xf32>
    %10 = arith.mulf %4, %9 : vector<8x12xf32>
    %cst = arith.constant dense<0.000000e+00> : vector<12xf32>
    %11 = vector.multi_reduction <add>, %10, %cst [0] : vector<8x12xf32> to vector<12xf32>
    %12 = vector.shape_cast %11 : vector<12xf32> to vector<1x12xf32>
    %c1_i32 = arith.constant 1 : i32
    %13 = vector.broadcast %c1_i32 : i32 to vector<8x1xi32>
    %14 = arith.cmpi eq, %3, %13 : vector<8x1xi32>
    %15 = arith.extui %14 : vector<8x1xi1> to vector<8x1xi32>
    %16 = arith.sitofp %15 : vector<8x1xi32> to vector<8x1xf32>
    %17 = vector.broadcast %16 : vector<8x1xf32> to vector<8x12xf32>
    %18 = arith.mulf %4, %17 : vector<8x12xf32>
    %cst_5 = arith.constant dense<0.000000e+00> : vector<12xf32>
    %19 = vector.multi_reduction <add>, %18, %cst_5 [0] : vector<8x12xf32> to vector<12xf32>
    %20 = vector.shape_cast %19 : vector<12xf32> to vector<1x12xf32>
    %c0_6 = arith.constant 0 : index
    %c0_7 = arith.constant 0 : index
    %21 = vector.load %arg13[%c0_6, %c0_7] : memref<2x12xf32, #tpu.memory_space<vmem>>, vector<2x12xf32>
    %22 = tpu.concatenate %12, %20 in 0 : vector<1x12xf32>, vector<1x12xf32> -> vector<2x12xf32>
    %23 = arith.addf %21, %22 : vector<2x12xf32>
    %c0_8 = arith.constant 0 : index
    %c0_9 = arith.constant 0 : index
    %24 = vector.load %arg13[%c0_8, %c0_9] : memref<2x12xf32, #tpu.memory_space<vmem>>, vector<2x12xf32>
    tpu.vector_store %arg13[%c0_8, %c0_9], %23 {strides = array<i32>} : memref<2x12xf32, #tpu.memory_space<vmem>>, vector<2x12xf32>,
    %c0_10 = arith.constant 0 : index
    %c0_11 = arith.constant 0 : index
    %25 = vector.load %arg3[%c0_10, %c0_11] : memref<8x1xi32, #tpu.memory_space<vmem>>, vector<8x1xi32>
    %c0_12 = arith.constant 0 : index
    %c0_13 = arith.constant 0 : index
    %26 = vector.load %arg4[%c0_12, %c0_13] : memref<8x10xf32, #tpu.memory_space<vmem>>, vector<8x10xf32>
    %c0_i32_14 = arith.constant 0 : i32
    %27 = vector.broadcast %c0_i32_14 : i32 to vector<8x1xi32>
    %28 = arith.cmpi eq, %25, %27 : vector<8x1xi32>
    %29 = arith.extui %28 : vector<8x1xi1> to vector<8x1xi32>
    %30 = arith.sitofp %29 : vector<8x1xi32> to vector<8x1xf32>
    %31 = vector.broadcast %30 : vector<8x1xf32> to vector<8x10xf32>
    %32 = arith.mulf %26, %31 : vector<8x10xf32>
    %cst_15 = arith.constant dense<0.000000e+00> : vector<10xf32>
    %33 = vector.multi_reduction <add>, %32, %cst_15 [0] : vector<8x10xf32> to vector<10xf32>
    %34 = vector.shape_cast %33 : vector<10xf32> to vector<1x10xf32>
    %c1_i32_16 = arith.constant 1 : i32
    %35 = vector.broadcast %c1_i32_16 : i32 to vector<8x1xi32>
    %36 = arith.cmpi eq, %25, %35 : vector<8x1xi32>
    %37 = arith.extui %36 : vector<8x1xi1> to vector<8x1xi32>
    %38 = arith.sitofp %37 : vector<8x1xi32> to vector<8x1xf32>
    %39 = vector.broadcast %38 : vector<8x1xf32> to vector<8x10xf32>
    %40 = arith.mulf %26, %39 : vector<8x10xf32>
    %cst_17 = arith.constant dense<0.000000e+00> : vector<10xf32>
    %41 = vector.multi_reduction <add>, %40, %cst_17 [0] : vector<8x10xf32> to vector<10xf32>
    %42 = vector.shape_cast %41 : vector<10xf32> to vector<1x10xf32>
    %c0_18 = arith.constant 0 : index
    %c0_19 = arith.constant 0 : index
    %43 = vector.load %arg14[%c0_18, %c0_19] : memref<2x10xf32, #tpu.memory_space<vmem>>, vector<2x10xf32>
    %44 = tpu.concatenate %34, %42 in 0 : vector<1x10xf32>, vector<1x10xf32> -> vector<2x10xf32>
    %45 = arith.addf %43, %44 : vector<2x10xf32>
    %c0_20 = arith.constant 0 : index
    %c0_21 = arith.constant 0 : index
    %46 = vector.load %arg14[%c0_20, %c0_21] : memref<2x10xf32, #tpu.memory_space<vmem>>, vector<2x10xf32>
    tpu.vector_store %arg14[%c0_20, %c0_21], %45 {strides = array<i32>} : memref<2x10xf32, #tpu.memory_space<vmem>>, vector<2x10xf32>,
    %c1_i32_22 = arith.constant 1 : i32
    %47 = arith.cmpi eq, %arg0, %c1_i32_22 : i32
    %48 = arith.extui %47 : i1 to i32
    %c0_i32_23 = arith.constant 0 : i32
    %49 = arith.cmpi ne, %48, %c0_i32_23 : i32
    scf.if %49 {
      %c0_24 = arith.constant 0 : index
      %c0_25 = arith.constant 0 : index
      %50 = vector.load %arg13[%c0_24, %c0_25] : memref<2x12xf32, #tpu.memory_space<vmem>>, vector<2x12xf32>
      %c0_26 = arith.constant 0 : index
      %c0_27 = arith.constant 0 : index
      %51 = vector.load %arg14[%c0_26, %c0_27] : memref<2x10xf32, #tpu.memory_space<vmem>>, vector<2x10xf32>
      %c0_28 = arith.constant 0 : index
      %c0_29 = arith.constant 0 : index
      %52 = vector.load %arg5[%c0_28, %c0_29] : memref<2x6xf32, #tpu.memory_space<vmem>>, vector<2x6xf32>
      %53 = tpu.concatenate %50, %51, %52 in 1 : vector<2x12xf32>, vector<2x10xf32>, vector<2x6xf32> -> vector<2x28xf32>
      %54 = arith.truncf %53 : vector<2x28xf32> to vector<2x28xbf16>
      %c0_30 = arith.constant 0 : index
      %c0_31 = arith.constant 0 : index
      %55 = vector.load %arg6[%c0_30, %c0_31] : memref<28x128xbf16, #tpu.memory_space<vmem>>, vector<28x128xbf16>
      %cst_32 = arith.constant dense<0.000000e+00> : vector<2x128xf32>
      %56 = tpu.matmul %54, %55, %cst_32 {dimension_numbers = #tpu.dot_dimension_numbers<[1], [0], [0], [1], [0, 0, 1, 1], [], []>} : vector<2x28xbf16>, vector<28x128xbf16>, vector<2x128xf32> -> vector<2x128xf32>
      %c0_33 = arith.constant 0 : index
      %c0_34 = arith.constant 0 : index
      %57 = vector.load %arg7[%c0_33, %c0_34] : memref<1x128xf32, #tpu.memory_space<vmem>>, vector<1x128xf32>
      %58 = vector.broadcast %57 : vector<1x128xf32> to vector<2x128xf32>
      %59 = arith.addf %56, %58 : vector<2x128xf32>
      %cst_35 = arith.constant 0.000000e+00 : f32
      %60 = vector.broadcast %cst_35 : f32 to vector<2x128xf32>
      %61 = arith.maximumf %59, %60 : vector<2x128xf32>
      %62 = arith.truncf %61 : vector<2x128xf32> to vector<2x128xbf16>
      %c0_36 = arith.constant 0 : index
      %c0_37 = arith.constant 0 : index
      %63 = vector.load %arg8[%c0_36, %c0_37] : memref<128x128xbf16, #tpu.memory_space<vmem>>, vector<128x128xbf16>
      %cst_38 = arith.constant dense<0.000000e+00> : vector<2x128xf32>
      %64 = tpu.matmul %62, %63, %cst_38 {dimension_numbers = #tpu.dot_dimension_numbers<[1], [0], [0], [1], [0, 0, 1, 1], [], []>} : vector<2x128xbf16>, vector<128x128xbf16>, vector<2x128xf32> -> vector<2x128xf32>
      %c0_39 = arith.constant 0 : index
      %c0_40 = arith.constant 0 : index
      %65 = vector.load %arg9[%c0_39, %c0_40] : memref<1x128xf32, #tpu.memory_space<vmem>>, vector<1x128xf32>
      %66 = vector.broadcast %65 : vector<1x128xf32> to vector<2x128xf32>
      %67 = arith.addf %64, %66 : vector<2x128xf32>
      %cst_41 = arith.constant 0.000000e+00 : f32
      %68 = vector.broadcast %cst_41 : f32 to vector<2x128xf32>
      %69 = arith.maximumf %67, %68 : vector<2x128xf32>
      %70 = arith.truncf %69 : vector<2x128xf32> to vector<2x128xbf16>
      %c0_42 = arith.constant 0 : index
      %c0_43 = arith.constant 0 : index
      %71 = vector.load %arg10[%c0_42, %c0_43] : memref<128x128xbf16, #tpu.memory_space<vmem>>, vector<128x128xbf16>
      %cst_44 = arith.constant dense<0.000000e+00> : vector<2x128xf32>
      %72 = tpu.matmul %70, %71, %cst_44 {dimension_numbers = #tpu.dot_dimension_numbers<[1], [0], [0], [1], [0, 0, 1, 1], [], []>} : vector<2x128xbf16>, vector<128x128xbf16>, vector<2x128xf32> -> vector<2x128xf32>
      %c0_45 = arith.constant 0 : index
      %c0_46 = arith.constant 0 : index
      %73 = vector.load %arg11[%c0_45, %c0_46] : memref<1x128xf32, #tpu.memory_space<vmem>>, vector<1x128xf32>
      %74 = vector.broadcast %73 : vector<1x128xf32> to vector<2x128xf32>
      %75 = arith.addf %72, %74 : vector<2x128xf32>
      %c0_47 = arith.constant 0 : index
      %c0_48 = arith.constant 0 : index
      %76 = vector.load %arg12[%c0_47, %c0_48] : memref<2x128xf32, #tpu.memory_space<vmem>>, vector<2x128xf32>
      tpu.vector_store %arg12[%c0_47, %c0_48], %75 {strides = array<i32>} : memref<2x128xf32, #tpu.memory_space<vmem>>, vector<2x128xf32>,
    } else {
    }
    return
  }
  func.func @transform_0(%arg0: i32) -> (i32, i32) {
    %c0_i32 = arith.constant 0 : i32
    %c0_i32_0 = arith.constant 0 : i32
    return %arg0, %c0_i32 : i32, i32
  }
  func.func @transform_1(%arg0: i32) -> (i32, i32) {
    %c0_i32 = arith.constant 0 : i32
    %c0_i32_0 = arith.constant 0 : i32
    return %arg0, %c0_i32 : i32, i32
  }
  func.func @transform_2(%arg0: i32) -> (i32, i32) {
    %c0_i32 = arith.constant 0 : i32
    %c0_i32_0 = arith.constant 0 : i32
    return %arg0, %c0_i32 : i32, i32
  }
  func.func @transform_3(%arg0: i32) -> (i32, i32) {
    %c0_i32 = arith.constant 0 : i32
    %c0_i32_0 = arith.constant 0 : i32
    return %arg0, %c0_i32 : i32, i32
  }
  func.func @transform_4(%arg0: i32) -> (i32, i32) {
    %c0_i32 = arith.constant 0 : i32
    %c0_i32_0 = arith.constant 0 : i32
    %c0_i32_1 = arith.constant 0 : i32
    return %c0_i32, %c0_i32_0 : i32, i32
  }
  func.func @transform_5(%arg0: i32) -> (i32, i32) {
    %c0_i32 = arith.constant 0 : i32
    %c0_i32_0 = arith.constant 0 : i32
    %c0_i32_1 = arith.constant 0 : i32
    return %c0_i32, %c0_i32_0 : i32, i32
  }
  func.func @transform_6(%arg0: i32) -> (i32, i32) {
    %c0_i32 = arith.constant 0 : i32
    %c0_i32_0 = arith.constant 0 : i32
    %c0_i32_1 = arith.constant 0 : i32
    return %c0_i32, %c0_i32_0 : i32, i32
  }
  func.func @transform_7(%arg0: i32) -> (i32, i32) {
    %c0_i32 = arith.constant 0 : i32
    %c0_i32_0 = arith.constant 0 : i32
    %c0_i32_1 = arith.constant 0 : i32
    return %c0_i32, %c0_i32_0 : i32, i32
  }
  func.func @transform_8(%arg0: i32) -> (i32, i32) {
    %c0_i32 = arith.constant 0 : i32
    %c0_i32_0 = arith.constant 0 : i32
    %c0_i32_1 = arith.constant 0 : i32
    return %c0_i32, %c0_i32_0 : i32, i32
  }
  func.func @transform_9(%arg0: i32) -> (i32, i32) {
    %c0_i32 = arith.constant 0 : i32
    %c0_i32_0 = arith.constant 0 : i32
    %c0_i32_1 = arith.constant 0 : i32
    return %c0_i32, %c0_i32_0 : i32, i32
  }
  func.func @transform_10(%arg0: i32) -> (i32, i32) {
    %c0_i32 = arith.constant 0 : i32
    %c0_i32_0 = arith.constant 0 : i32
    %c0_i32_1 = arith.constant 0 : i32
    return %c0_i32, %c0_i32_0 : i32, i32
  }
  func.func @transform_11(%arg0: i32) -> (i32, i32) {
    %c0_i32 = arith.constant 0 : i32
    %c0_i32_0 = arith.constant 0 : i32
    %c0_i32_1 = arith.constant 0 : i32
    return %c0_i32, %c0_i32_0 : i32, i32
  }
}

</mosaic_0001>

<bundles_post_ra>
// kernel: tpu_custom_call.1
= control target key start
LH: loop header
LB: loop body
LE: loop exit
PB: predicated region body
PF: predicated region fallthrough
CT: control target
= control target key end

     0   :  { %s1827_s0 = inlined_call_operand.vmem [shape: s32[16,1], index: 0, kind: input, shape index: {}]   ;;  %s1828_s1 = inlined_call_operand.hbm [shape: f32[16,12], index: 1, kind: input, shape index: {}]   ;;  %s1829_s2 = inlined_call_operand.vmem [shape: s32[16,1], index: 2, kind: input, shape index: {}]   ;;  %s1830_s3 = inlined_call_operand.hbm [shape: f32[16,10], index: 3, kind: input, shape index: {}]   ;;  %s1831_s4 = inlined_call_operand.vmem [shape: f32[2,6], index: 4, kind: input, shape index: {}]   ;;  %s1832_s5 = inlined_call_operand.hbm [shape: bf16[28,128], index: 5, kind: input, shape index: {}]   ;;  %s1833_s6 = inlined_call_operand.vmem [shape: f32[1,128], index: 6, kind: input, shape index: {}]   ;;  %s1834_s7 = inlined_call_operand.hbm [shape: bf16[128,128], index: 7, kind: input, shape index: {}]   ;;  %s1835_s8 = inlined_call_operand.vmem [shape: f32[1,128], index: 8, kind: input, shape index: {}]   ;;  %s1836_s9 = inlined_call_operand.vmem [shape: bf16[128,128], index: 9, kind: input, shape index: {}]   ;;  %s1837_s10 = inlined_call_operand.vmem [shape: f32[1,128], index: 10, kind: input, shape index: {}]   ;;  %s1838_s11 = inlined_call_operand.hbm [shape: f32[2,128], index: 11, kind: output, shape index: {}]  }
   0x1   :  { %1844 = sst [smem:[#allocation20_spill]] %s1832_s5 }
   0x2   :  { %1845 = sst [smem:[#allocation21_spill]] %s1834_s7 }
   0x3   :  { %1846 = sst [smem:[#allocation22_spill]] %s1838_s11 }
   0x4   :  { %16 = vsyncpa [#allocation5], 0 }
   0x5   :  { %18 = vsyncpa [#allocation5 + $0x1], 0 }
   0x6   :  { %19 = vsyncpa [#allocation8], 0 }
   0x7   :  { %21 = vsyncpa [#allocation8 + $0x1], 0 }
   0x8   :  { %22 = vsyncpa [#allocation11], 0 }
   0x9   :  { %23 = vsyncpa [#allocation6], 0  ;;  %s1514_s17 = smov 0   ;;  %s1516_s18 = smov 0  }
   0xa   :  { %s1518_s19 = smov 0   ;;  %s1520_s20 = smov 0  }
   0xb LB: > { %1847 = sst [smem:[#allocation18_spill]] %s1434_s19  ;;  %s1533_s21 = sadd.s32 4294967295, %s1438_s20   ;;  %s1438_s20 = sphi %s1520_s20, %s1867_s20   ;;  %s1434_s19 = sphi %s1518_s19, %s1864_s19   ;;  %s1430_s18 = sphi %s1516_s18, %s1866_s18   ;;  %s1426_s17 = sphi %s1514_s17, %s1865_s17  }
   0xc   : > { %p75_p0 = scmp.ne.s32.totalorder %s1430_s18, %s1426_s17  ;;  %p1839_p1 = scmp.eq.s32.totalorder %s1533_s21, 0 }
   0xd   : > { %p1020_p2 = scmp.ge.s32.totalorder %s1438_s20, 1  ;;  %p306_p3 = scmp.lt.s32.totalorder %s1438_s20, 3 }
   0xe   : > { %p1542_p5 = por %p1839_p1, %p75_p0  ;;  %s1440_s24 = smov [#allocation9]  }
   0xf   : > { %p1546_p6 = pnand %p1020_p2, %p306_p3  ;;  %s321_s25 = sshll.u32 %s1440_s24, 4  ;;  %s322_s25 = int_to_ptr.vmem [resolvable:$true] %s321_s25 }
  0x10   : > { %s1848_s22 = scalar_select %p1542_p5, 1, 0 }
  0x11   : > { %s1849_s23 = scalar_select %p1546_p6, 1, 0 }
  0x12   : > { %p1152_p7 = pneg %p1546_p6  ;;  %s1441_s27 = smov [#allocation10]  }
  0x13   : > { %s337_s28 = sshll.u32 %s1441_s27, 4  ;;  %s1851_s5 = sld [smem:[#allocation20_spill]]  ;;  %s1558_s28 = int_to_ptr.vmem [resolvable:$true] %s337_s28 }
  0x14   : > { %p1554_p8 = pnand %p1152_p7, %p1839_p1 }
  0x16   : > { %p1248_p10 = pneg %p1554_p8 }
  0x19   : > { %s1246_s12 = scalar_lea.hbm %s1851_s5, 256 }
  0x1a   : > { %p1247_p9 = scmp.ne.s32.totalorder %s1851_s5, %s1246_s12  ;;  %p1253_p13 = scmp.lt.u32.totalorder %s1246_s12, %s1851_s5 }
  0x1c   : > { %p1249_p11 = pnand %p1248_p10, %p1247_p9 }
  0x1e   : > { %p1250_p12 = pneg %p1249_p11 }
  0x20   : > { %p1255_p0 = pnand %p1253_p13, %p1250_p12 }
  0x22   : > { %1258 = shalt.err (!%p1255_p0)
}
  0x23   : > { %s1259_s17 = scalar_lea.vmem %s322_s25, 256  ;;  %p1267_p4 = scmp.lt.s32.totalorder %s322_s25, %s322_s25 }
  0x24   : > { %p1260_p2 = scmp.ne.s32.totalorder %s322_s25, %s1259_s17  ;;  %p1268_p1 = scmp.lt.s32.totalorder %s1259_s17, %s1259_s17 }
  0x26   : > { %p1262_p3 = pnand %p1260_p2, %p1248_p10  ;;  %p1269_p5 = por %p1268_p1, %p1267_p4 }
  0x28   : > { %p1263_p7 = pneg %p1262_p3 }
  0x2a   : > { %p1270_p6 = pnand %p1269_p5, %p1263_p7 }
  0x2c   : > { %1273 = shalt.err (!%p1270_p6)
}
  0x2d   : > { %s1442_s24 = smov 64   ;;  %s1443_s27 = smov 4  }
  0x2e   : > { %1155 = dma.hbm_to_vmem [thread:$0]  (!%p1554_p8), %s1851_s5, 256, %s322_s25, [#allocation8], %s1442_s24, %s1442_s24, %s1443_s27  }
  0x2f   : > { %s1852_s7 = sld [smem:[#allocation21_spill]] }
  0x35   : > { %s1274_s14 = scalar_lea.hbm %s1852_s7, 1024 }
  0x36   : > { %p1275_p9 = scmp.ne.s32.totalorder %s1852_s7, %s1274_s14  ;;  %p1281_p5 = scmp.lt.u32.totalorder %s1274_s14, %s1852_s7 }
  0x38   : > { %p1277_p1 = pnand %p1275_p9, %p1248_p10 }
  0x3a   : > { %p1278_p4 = pneg %p1277_p1 }
  0x3c   : > { %p1283_p6 = pnand %p1281_p5, %p1278_p4 }
  0x3e   : > { %1286 = shalt.err (!%p1283_p6)
}
  0x3f   : > { %s1287_s25 = scalar_lea.vmem %s1558_s28, 1024  ;;  %p1295_p0 = scmp.lt.s32.totalorder %s1558_s28, %s1558_s28 }
  0x40   : > { %p1288_p11 = scmp.ne.s32.totalorder %s1558_s28, %s1287_s25  ;;  %p1296_p2 = scmp.lt.s32.totalorder %s1287_s25, %s1287_s25 }
  0x42   : > { %p1290_p12 = pnand %p1288_p11, %p1248_p10  ;;  %p1297_p3 = por %p1296_p2, %p1295_p0 }
  0x44   : > { %p1291_p13 = pneg %p1290_p12 }
  0x46   : > { %p1298_p7 = pnand %p1297_p3, %p1291_p13 }
  0x48   : > { %1301 = shalt.err (!%p1298_p7)
}
  0x49   : > { %1158 = dma.hbm_to_vmem [thread:$0]  (!%p1554_p8), %s1852_s7, 1024, %s1558_s28, [#allocation11], %s1442_s24, %s1442_s24, %s1443_s27  }
  0x4a   : > { %s1608_s30 = sadd.s32 1, %s1438_s20   ;;  %s62_s12 = sadd.s32 1, %s1434_s19 }
  0x4b   : > { %s59_s26 = ssub.s32 %s1438_s20, %s1608_s30  ;;  %p69_p10 = scmp.ne.s32.totalorder %s1434_s19, %s1430_s18 }
  0x4c   : > { %p60_p9 = scmp.eq.s32.totalorder %s59_s26, 0  ;;  %p70_p1 = scmp.eq.s32.totalorder %s1438_s20, 0 }
  0x4d   : > { %p1168_p4 = scmp.lt.s32.totalorder %s1438_s20, 2  ;;  %s367_s13 = sand.u32 1, %s1434_s19  }
  0x4e   : > { %s1619_s14 = scalar_select %p60_p9, %s1434_s19, %s62_s12  }
  0x4f   : > { %p71_p5 = por %p70_p1, %p69_p10  ;;  %s1621_s15 = sshll.u32 %s367_s13, 3 }
  0x50   : > { %1853 = sst [smem:[#allocation19_spill]] %s1619_s14  ;;  %s1025_s16 = sshll.u32 %s1438_s20, 7 }
  0x51   : > { %s1627_s28 = scalar_lea.hbm %s1828_s1, %s1025_s16  ;;  %s371_s24 = scalar_lea.vmem [#allocation4], %s1621_s15 }
  0x52   : > { %s378_s27 = sshll.u32 %s371_s24, 4  ;;  %p1630_p8 = pnand %p1168_p4, %p71_p5  ;;  %s1634_s27 = int_to_ptr.vmem [resolvable:$true] %s378_s27 }
  0x53   : > { %s1639_s26 = scalar_lea.hbm %s1830_s3, %s1025_s16  ;;  %s368_s17 = scalar_lea.sflag [#allocation5], %s367_s13 }
  0x54   : > { %s1302_s25 = scalar_lea.hbm %s1627_s28, 128  ;;  %p1304_p11 = pneg %p1630_p8 }
  0x55   : > { %p1303_p6 = scmp.ne.s32.totalorder %s1627_s28, %s1302_s25  ;;  %s1307_s7 = scalar_lea.hbm %s1828_s1, 256 }
  0x56   : > { %p1308_p0 = scmp.lt.u32.totalorder %s1627_s28, %s1828_s1  ;;  %p1309_p2 = scmp.lt.u32.totalorder %s1307_s7, %s1302_s25 }
  0x57   : > { %p1305_p12 = pnand %p1304_p11, %p1303_p6  ;;  %p1311_p7 = scmp.lt.u32.totalorder %s1302_s25, %s1627_s28 }
  0x58   : > { %p1310_p3 = por %p1309_p2, %p1308_p0 }
  0x59   : > { %p1306_p13 = pneg %p1305_p12 }
  0x5a   : > { %p1312_p10 = por %p1311_p7, %p1310_p3 }
  0x5c   : > { %p1313_p9 = pnand %p1312_p10, %p1306_p13 }
  0x5e   : > { %1316 = shalt.err (!%p1313_p9)
}
  0x5f   : > { %s1317_s13 = scalar_lea.vmem %s1634_s27, 128  ;;  %s1444_s5 = smov [#allocation4]  }
  0x60   : > { %p1318_p1 = scmp.ne.s32.totalorder %s1634_s27, %s1317_s13  ;;  %s1322_s16 = sshll.u32 %s1444_s5, 4  ;;  %s1323_s16 = int_to_ptr.vmem [resolvable:$false] %s1322_s16 }
  0x61   : > { %s1324_s19 = scalar_lea.vmem %s1323_s16, 256  ;;  %p1325_p6 = scmp.lt.s32.totalorder %s1634_s27, %s1323_s16 }
  0x62   : > { %p1320_p4 = pnand %p1318_p1, %p1304_p11  ;;  %p1326_p12 = scmp.lt.s32.totalorder %s1324_s19, %s1317_s13 }
  0x64   : > { %p1321_p5 = pneg %p1320_p4  ;;  %p1327_p0 = por %p1326_p12, %p1325_p6 }
  0x66   : > { %p1328_p2 = pnand %p1327_p0, %p1321_p5 }
  0x68   : > { %1331 = shalt.err (!%p1328_p2)
}
  0x69   : > { %1162 = dma.hbm_to_vmem [thread:$0]  (!%p1630_p8), %s1627_s28, 128, %s1634_s27, %s368_s17  }
  0x6a   : > { %s392_s7 = sand.u32 1, %s1438_s20   ;;  %s396_s14 = scalar_lea.vmem [#allocation7], %s1621_s15 }
  0x6b   : > { %s403_s29 = sshll.u32 %s396_s14, 4  ;;  %s393_s12 = scalar_lea.sflag [#allocation8], %s392_s7  ;;  %s404_s29 = int_to_ptr.vmem [resolvable:$true] %s403_s29 }
  0x6c   : > { %s1332_s25 = scalar_lea.hbm %s1639_s26, 128  ;;  %s1337_s5 = scalar_lea.hbm %s1830_s3, 256 }
  0x6d   : > { %p1333_p13 = scmp.ne.s32.totalorder %s1639_s26, %s1332_s25  ;;  %p1338_p10 = scmp.lt.u32.totalorder %s1639_s26, %s1830_s3 }
  0x6e   : > { %p1339_p9 = scmp.lt.u32.totalorder %s1337_s5, %s1332_s25  ;;  %p1341_p4 = scmp.lt.u32.totalorder %s1332_s25, %s1639_s26 }
  0x6f   : > { %p1335_p3 = pnand %p1333_p13, %p1304_p11 }
  0x70   : > { %p1340_p1 = por %p1339_p9, %p1338_p10 }
  0x71   : > { %p1336_p7 = pneg %p1335_p3 }
  0x72   : > { %p1342_p5 = por %p1341_p4, %p1340_p1 }
  0x74   : > { %p1343_p6 = pnand %p1342_p5, %p1336_p7 }
  0x76   : > { %1346 = shalt.err (!%p1343_p6)
}
  0x77   : > { %s1347_s20 = scalar_lea.vmem %s404_s29, 128  ;;  %s1445_s15 = smov [#allocation7]  }
  0x78   : > { %p1348_p12 = scmp.ne.s32.totalorder %s404_s29, %s1347_s20  ;;  %s1352_s28 = sshll.u32 %s1445_s15, 4  ;;  %s1353_s28 = int_to_ptr.vmem [resolvable:$false] %s1352_s28 }
  0x79   : > { %s1354_s27 = scalar_lea.vmem %s1353_s28, 256  ;;  %p1355_p13 = scmp.lt.s32.totalorder %s404_s29, %s1353_s28 }
  0x7a   : > { %p1350_p0 = pnand %p1348_p12, %p1304_p11  ;;  %p1356_p3 = scmp.lt.s32.totalorder %s1354_s27, %s1347_s20 }
  0x7c   : > { %p1351_p2 = pneg %p1350_p0  ;;  %p1357_p9 = por %p1356_p3, %p1355_p13 }
  0x7e   : > { %p1358_p10 = pnand %p1357_p9, %p1351_p2 }
  0x80   : > { %1361 = shalt.err (!%p1358_p10)
}
  0x81   : > { %1165 = dma.hbm_to_vmem [thread:$0]  (!%p1630_p8), %s1639_s26, 128, %s404_s29, %s393_s12  }
  0x82   : > { %p1855_p7 = scmp.ne.s32.totalorder %s1849_s23, 0 }
  0x83   : > { %s414_s17 = sand.u32 (!%p1855_p7), 1, %s1430_s18   ;;  %p1856_p11 = scmp.ne.s32.totalorder (!%p1855_p7), %s1848_s22, 0 }
  0x84   : > { %412 = sbr.rel (%p1855_p7) target bundleno = 1129 (0x469), region = 64  ;;  %s1690_s7 = sshll.u32 (!%p1855_p7), %s414_s17, 3 }
  0x85   : > { %s415_s14 = scalar_lea.sflag (!%p1855_p7), [#allocation5], %s414_s17  ;;  %s418_s25 = scalar_lea.vmem (!%p1855_p7), [#allocation4], %s1690_s7 }
  0x8b   : > { %1405 = dma.done.wait (%p1856_p11), %s415_s14, 128  }
  0x8c   : > { %1407 = vsyncadd (%p1856_p11), %s415_s14, 4294967168  ;;  %s423_s11 = sand.u32 1, %s1533_s21   ;;  %s427_s23 = scalar_lea.vmem [#allocation7], %s1690_s7 }
  0x8d   : > { %s424_s26 = scalar_lea.sflag [#allocation8], %s423_s11 }
  0x8e   : > { %1409 = dma.done.wait (%p1856_p11), %s424_s26, 128  }
  0x8f   : > { %1411 = vsyncadd (%p1856_p11), %s424_s26, 4294967168  ;;  %p1857_p8 = scmp.eq.s32.totalorder %s1533_s21, 0 }
  0x91   : > { %1413 = dma.done.wait (%p1857_p8), [#allocation8], 256   ;;  %p1858_p1 = pmov %p1857_p8 }
  0x93   : > { %1415 = vsyncadd (%p1858_p1), [#allocation8], 4294967040  ;;  %p1859_p4 = pmov %p1858_p1 }
  0x94   : > { %p1860_p5 = pmov %p1858_p1 }
  0x95   : > { %1417 = dma.done.wait (%p1859_p4), [#allocation11], 1024  }
  0x96   : > { %1419 = vsyncadd (%p1860_p5), [#allocation11], 4294966272  ;;  %p482_p6 = scmp.lt.s32.totalorder %s1533_s21, 1  ;;  %p1861_p12 = scmp.ne.s32.totalorder %s1533_s21, 0 }
  0x97   : > { %vm495_vm0 = vcmask (!%p1861_p12), 91136   ;;  %vm497_vm1 = vcmask (!%p1861_p12), 74752   ;;  %v1446_v0 = vmov (!%p1861_p12), 0.0  }
  0x98   : > { %s483_s29 = scalar_select %p482_p6, %s1533_s21, 1 }
  0x99   : > { %494 = sbr.rel (%p1861_p12) target bundleno = 160 (0xa0), region = 84  ;;  %496 = vst.msk [vmem:[#allocation2] sm:$0x3] (!%p1861_p12), %vm495_vm0, %v1446_v0 }
  0x9a   : > { %s1033_s12 = sshll.u32 %s483_s29, 3  ;;  %498 = vst.msk [vmem:[#allocation3] sm:$0x3] (!%p1861_p12), %vm497_vm1, %v1446_v0 }
  0x9b   : > { %s485_s13 = scalar_lea.vmem %s1827_s0, %s1033_s12  ;;  %s489_s19 = scalar_lea.vmem %s1829_s2, %s1033_s12 }
  0xa0 PF: > { %v499_v1 = vld [vmem:[%s485_s13] sm:$0xff]  ;;  %v1447_v3 = vmov 0   ;;  %v1448_v4 = vmov 0.0   ;;  %v500_v11 = vld [vmem:[%s418_s25] sm:$0xff]  ;;  %vm510_vm6 = vcmask 97280   ;;  %vm551_vm7 = vcmask 80896  }
  0xa1   : > { %v540_v2 = vld [vmem:[%s489_s19] sm:$0xff]  ;;  %1217 = vset.pattern.permute.xlu0 %v1447_v3  ;;  %vm501_vm2 = vcmp.eq.s32.totalorder %v499_v1, 0  ;;  %vm518_vm3 = vcmp.eq.s32.totalorder %v499_v1, 1  ;;  %vm535_vm8 = vcmask 1040384   ;;  %v534_v43 = vld [vmem:[#allocation2] sm:$0x3] }
  0xa2   : > { %vm542_vm4 = vcmp.eq.s32.totalorder %v540_v2, 0  ;;  %vm559_vm5 = vcmp.eq.s32.totalorder %v540_v2, 1  ;;  %v1036_v5 = vsel %vm501_vm2, 1.0, %v1448_v4  ;;  %v1037_v6 = vsel %vm518_vm3, 1.0, %v1448_v4  ;;  %v541_v17 = vld [vmem:[%s427_s23] sm:$0xff]  ;;  %p1040_p0 = scmp.ne.s32.totalorder %s1533_s21, 1 }
  0xa3   : > { %v1038_v7 = vsel %vm542_vm4, 1.0, %v1448_v4  ;;  %v1039_v8 = vsel %vm559_vm5, 1.0, %v1448_v4  ;;  %v1218_v9 = vpack.i.bf16 %v1037_v6, %v1036_v5  ;;  %vm538_vm9 = vcmask 91136   ;;  %v575_v52 = vld [vmem:[#allocation3] sm:$0x3]  ;;  %s1449_s20 = smov (!%p1040_p0), 12  }
  0xa4   : > { %v1223_v10 = vpack.i.bf16 %v1039_v8, %v1038_v7  ;;  %vm578_vm10 = vcmask 74752   ;;  %v586_v58 = vld [vmem:[%s1831_s4] sm:$0x3] (!%p1040_p0)  ;;  %v1228_v59 = vld [vmem:[#allocation9] sm:$0xff] (!%p1040_p0)   ;;  %v1450_v60 = vmov (!%p1040_p0), 0.0   ;;  %vm625_vm11 = vcmask (!%p1040_p0), 1045504  }
  0xa5   : > { %1219 = vperm.xlu0 %1217, %v1218_v9   ;;  %1088 = vmatprep.subr.bf16.mxu0 (!%p1040_p0), %v1450_v60  ;;  %v1229_v61 = vld [vmem:[#allocation9 + $0x8] sm:$0x3f] (!%p1040_p0)   ;;  %vm1451_vm12 = vmmov (!%p1040_p0), 0   ;;  %v1230_v62 = vld [vmem:[#allocation10] sm:$0xff] (!%p1040_p0)   ;;  %s1452_s27 = smov (!%p1040_p0), 22   ;;  %v1231_v0 = vld [vmem:[#allocation10 + $0x8] sm:$0xff] (!%p1040_p0)  }
  0xa6   : > { %1096 = vmatprep.subr.bf16.mxu1 (!%p1040_p0), %v1450_v60  ;;  %1089 = vmatpush3.bf16.msra.mxu0 (!%p1040_p0), %v1228_v59  ;;  %v627_v63 = vsel (!%p1040_p0), %vm625_vm11, %v1229_v61, 0  ;;  %v1232_v1 = vld [vmem:[#allocation10 + $0x10] sm:$0xff] (!%p1040_p0)   ;;  %v1233_v2 = vld [vmem:[#allocation10 + $0x18] sm:$0xff] (!%p1040_p0)   ;;  %v1234_v3 = vld [vmem:[#allocation10 + $0x20] sm:$0xff] (!%p1040_p0)   ;;  %vm596_vm13 = vcmask (!%p1040_p0), 179200   ;;  %vm621_vm14 = vcmask (!%p1040_p0), 228352  }
  0xa7   : > { %1090 = vmatprep.subr.bf16.mxu0 (!%p1040_p0), %v1450_v60  ;;  %1092 = vmatprep.mubr.msk.bf16.mxu0 (!%p1040_p0), %vm1451_vm12, %v1450_v60  ;;  %v1235_v4 = vld [vmem:[#allocation10 + $0x28] sm:$0xff] (!%p1040_p0)  }
  0xa8   : > { %1112 = vmatprep.mubr.msk.bf16.mxu1 (!%p1040_p0), %vm1451_vm12, %v1450_v60  ;;  %1097 = vmatpush3.bf16.msra.mxu1 (!%p1040_p0), %v1230_v62 }
  0xa9   : > { %1224 = vperm.xlu0 %1217, %v1223_v10   ;;  %1098 = vmatprep.subr.bf16.mxu1 (!%p1040_p0), %v1450_v60 }
  0xaa   : > { %1091 = vmatpush3.bf16.msra.mxu0 (!%p1040_p0), %v627_v63 }
  0xab   : > { %1116 = vmatprep.subr.bf16.mxu0 (!%p1040_p0), %v1450_v60 }
  0xac   : > { %1099 = vmatpush3.bf16.msra.mxu1 (!%p1040_p0), %v1231_v0 }
  0xad   : > { %1100 = vmatprep.subr.bf16.mxu1 (!%p1040_p0), %v1450_v60 }
  0xb0   : > { %1101 = vmatpush3.bf16.msra.mxu1 (!%p1040_p0), %v1232_v1 }
  0xb1   : > { %1102 = vmatprep.subr.bf16.mxu1 (!%p1040_p0), %v1450_v60 }
  0xb4   : > { %1103 = vmatpush3.bf16.msra.mxu1 (!%p1040_p0), %v1233_v2 }
  0xb5   : > { %1104 = vmatprep.subr.bf16.mxu1 (!%p1040_p0), %v1450_v60 }
  0xb8   : > { %1105 = vmatpush3.bf16.msra.mxu1 (!%p1040_p0), %v1234_v3 }
  0xb9   : > { %1106 = vmatprep.subr.bf16.mxu1 (!%p1040_p0), %v1450_v60 }
  0xbc   : > { %1107 = vmatpush3.bf16.msra.mxu1 (!%p1040_p0), %v1235_v4 }
  0xbd   : > { %1108 = vmatprep.subr.bf16.mxu1 (!%p1040_p0), %v1450_v60 }
 0x124   : > { %v1220_v12 = vpop.permute.xlu0 %1219 }
 0x125   : > { %v1222_v13 = vunpack.i.h.bf16 %v1220_v12  ;;  %v1221_v14 = vunpack.i.l.bf16 %v1220_v12  ;;  %v1237_v12 = vld [vmem:[#allocation10 + $0x38] sm:$0xff] (!%p1040_p0)  }
 0x127   : > { %v526_v15 = vmul.f32 %v1222_v13, %v500_v11  ;;  %v509_v16 = vmul.f32 %v1221_v14, %v500_v11  ;;  %v1236_v11 = vld [vmem:[#allocation10 + $0x30] sm:$0xff] (!%p1040_p0)   ;;  %v1238_v13 = vld [vmem:[%s1836_s9] sm:$0xff] (!%p1040_p0)  }
 0x128   : > { %v1225_v18 = vpop.permute.xlu0 %1224  ;;  %1109 = vmatpush3.bf16.msra.mxu1 (!%p1040_p0), %v1236_v11  ;;  %v1239_v14 = vld [vmem:[%s1836_s9 + $0x8] sm:$0xff] (!%p1040_p0)  }
 0x129   : > { %v527_v19 = vsel %vm510_vm6, %v526_v15, 0.0  ;;  %v511_v20 = vsel %vm510_vm6, %v509_v16, 0.0  ;;  %v1227_v21 = vunpack.i.h.bf16 %v1225_v18  ;;  %v1226_v22 = vunpack.i.l.bf16 %v1225_v18  ;;  %1110 = vmatprep.subr.bf16.mxu1 (!%p1040_p0), %v1450_v60  ;;  %v1240_v15 = vld [vmem:[%s1836_s9 + $0x10] sm:$0xff] (!%p1040_p0)   ;;  %v1241_v16 = vld [vmem:[%s1836_s9 + $0x18] sm:$0xff] (!%p1040_p0)   ;;  %v1243_v18 = vld [vmem:[%s1836_s9 + $0x28] sm:$0xff] (!%p1040_p0)  }
 0x12a   : > { %v528_v23 = vrot.slane %v527_v19, 4  ;;  %v512_v24 = vrot.slane %v511_v20, 4 }
 0x12b   : > { %v567_v25 = vmul.f32 %v1227_v21, %v541_v17  ;;  %v550_v26 = vmul.f32 %v1226_v22, %v541_v17  ;;  %v1242_v17 = vld [vmem:[%s1836_s9 + $0x20] sm:$0xff] (!%p1040_p0)  }
 0x12c   : > { %v529_v27 = vadd.f32 %v528_v23, %v527_v19  ;;  %v513_v28 = vadd.f32 %v512_v24, %v511_v20  ;;  %1111 = vmatpush3.bf16.msra.mxu1 (!%p1040_p0), %v1237_v12  ;;  %v1041_v19 = vld [vmem:[%s1833_s6] ss:$0 sm:$0xff] (!%p1040_p0) }
 0x12d   : > { %v568_v29 = vsel %vm551_vm7, %v567_v25, 0.0  ;;  %v552_v30 = vsel %vm551_vm7, %v550_v26, 0.0 }
 0x12e   : > { %v530_v31 = vrot.slane %v529_v27, 2  ;;  %v514_v32 = vrot.slane %v513_v28, 2  ;;  %v569_v33 = vrot.slane %v568_v29, 4  ;;  %v553_v34 = vrot.slane %v552_v30, 4 }
 0x130   : > { %v531_v35 = vadd.f32 %v530_v31, %v529_v27  ;;  %v515_v36 = vadd.f32 %v514_v32, %v513_v28  ;;  %v570_v37 = vadd.f32 %v569_v33, %v568_v29  ;;  %v554_v38 = vadd.f32 %v553_v34, %v552_v30  ;;  %v1244_v27 = vld [vmem:[%s1836_s9 + $0x30] sm:$0xff] (!%p1040_p0)   ;;  %v1245_v28 = vld [vmem:[%s1836_s9 + $0x38] sm:$0xff] (!%p1040_p0)   ;;  %v1045_v29 = vld [vmem:[%s1835_s8] ss:$0 sm:$0xff] (!%p1040_p0) }
 0x132   : > { %v532_v39 = vrot.slane %v531_v35, 1  ;;  %v516_v40 = vrot.slane %v515_v36, 1  ;;  %v571_v41 = vrot.slane %v570_v37, 2  ;;  %v555_v42 = vrot.slane %v554_v38, 2 }
 0x134   : > { %v533_v44 = vadd.f32 %v532_v39, %v531_v35  ;;  %v517_v45 = vadd.f32 %v516_v40, %v515_v36  ;;  %v572_v46 = vadd.f32 %v571_v41, %v570_v37  ;;  %v556_v47 = vadd.f32 %v555_v42, %v554_v38  ;;  %v1054_v37 = vld [vmem:[%s1837_s10] ss:$0 sm:$0xff] (!%p1040_p0) }
 0x136   : > { %v536_v48 = vsel %vm535_vm8, %v517_v45, %v533_v44  ;;  %v573_v49 = vrot.slane %v572_v46, 1  ;;  %v557_v50 = vrot.slane %v556_v47, 1 }
 0x137   : > { %v537_v51 = vadd.f32 %v536_v48, %v534_v43  ;;  %583 = sbr.rel (%p1040_p0) target bundleno = 1098 (0x44a), region = 88 }
 0x138   : > { %v574_v53 = vadd.f32 %v573_v49, %v572_v46  ;;  %v558_v54 = vadd.f32 %v557_v50, %v556_v47 }
 0x139   : > { %539 = vst.msk [vmem:[#allocation2] sm:$0x3] %vm538_vm9, %v537_v51 }
 0x13a   : > { %v576_v55 = vsel %vm535_vm8, %v558_v54, %v574_v53 }
 0x13b   : > { %v577_v56 = vadd.f32 %v576_v55, %v575_v52 }
 0x13d   : > { %579 = vst.msk [vmem:[#allocation3] sm:$0x3] %vm578_vm10, %v577_v56 }
 0x140   : > { %v584_v6 = vld [vmem:[#allocation2] sm:$0x3] }
 0x144   : > { %v585_v57 = vld [vmem:[#allocation3] sm:$0x3] }
 0x145   : > { %588 = vrot.lane.b32.xlu0 %v585_v57, %s1449_s20 }
 0x149   : > { %592 = vrot.lane.b32.xlu0 %v586_v58, %s1452_s27 }
 0x1b7   : > { %v589_v5 = vpop.permute.xlu0 %588 }
 0x1b8   : > { %v595_v7 = vsel %vm510_vm6, %v584_v6, %v589_v5 }
 0x1bb   : > { %v593_v8 = vpop.permute.xlu0 %592 }
 0x1bc   : > { %v597_v9 = vsel %vm596_vm13, %v595_v7, %v593_v8 }
 0x1bd   : > { %v598_v10 = vpack.c.bf16 %v597_v9, %v597_v9 }
 0x1bf   : > { %1093 = vmatmul.mubr.msk.bf16.vlgmr.msra.gmra.mrb[0].mxu0 %vm621_vm14, %v598_v10 }
 0x1c0   : > { %1132 = vmatprep.mubr.msk.bf16.mxu0 %vm1451_vm12, %v1450_v60  ;;  %1117 = vmatpush3.bf16.msra.mxu0 %v1238_v13 }
 0x1c1   : > { %1118 = vmatprep.subr.bf16.mxu0 %v1450_v60 }
 0x1c4   : > { %1119 = vmatpush3.bf16.msra.mxu0 %v1239_v14 }
 0x1c5   : > { %1120 = vmatprep.subr.bf16.mxu0 %v1450_v60 }
 0x1c8   : > { %1121 = vmatpush3.bf16.msra.mxu0 %v1240_v15 }
 0x1c9   : > { %1122 = vmatprep.subr.bf16.mxu0 %v1450_v60 }
 0x1cc   : > { %1123 = vmatpush3.bf16.msra.mxu0 %v1241_v16 }
 0x1cd   : > { %1124 = vmatprep.subr.bf16.mxu0 %v1450_v60 }
 0x1d0   : > { %1125 = vmatpush3.bf16.msra.mxu0 %v1242_v17 }
 0x1d1   : > { %1126 = vmatprep.subr.bf16.mxu0 %v1450_v60 }
 0x1d4   : > { %1127 = vmatpush3.bf16.msra.mxu0 %v1243_v18 }
 0x1d5   : > { %1128 = vmatprep.subr.bf16.mxu0 %v1450_v60 }
 0x1d8   : > { %1129 = vmatpush3.bf16.msra.mxu0 %v1244_v27 }
 0x1d9   : > { %1130 = vmatprep.subr.bf16.mxu0 %v1450_v60 }
 0x1dc   : > { %1131 = vmatpush3.bf16.msra.mxu0 %v1245_v28 }
 0x292   : > { %v663_v20 = vpop.f32.mrb[0].mxu0 }
 0x293   : > { %v664_v21 = vadd.f32 %v1041_v19, %v663_v20  ;;  %v1094_v22 = vpop.f32.mrb[1].mxu0 }
 0x294   : > { %v666_v23 = vpop.f32.mrb[2].mxu0 }
 0x295   : > { %v669_v24 = vmax.f32 %v664_v21, 0.0  ;;  %v1095_v25 = vpop.f32.mrb[3].mxu0 }
 0x297   : > { %v670_v26 = vpack.c.bf16 %v669_v24, %v669_v24 }
 0x299   : > { %1113 = vmatmul.mubr.bf16.vlgmr.msra.gmra.mrb[0].mxu1 %v670_v26 }
 0x36c   : > { %v776_v30 = vpop.f32.mrb[0].mxu1 }
 0x36d   : > { %v777_v31 = vadd.f32 %v1045_v29, %v776_v30  ;;  %v1114_v32 = vpop.f32.mrb[1].mxu1 }
 0x36e   : > { %v779_v33 = vpop.f32.mrb[2].mxu1 }
 0x36f   : > { %v782_v34 = vmax.f32 %v777_v31, 0.0  ;;  %v1115_v35 = vpop.f32.mrb[3].mxu1 }
 0x371   : > { %v783_v36 = vpack.c.bf16 %v782_v34, %v782_v34 }
 0x373   : > { %1133 = vmatmul.mubr.bf16.vlgmr.msra.gmra.mrb[4].mxu0 %v783_v36 }
 0x446   : > { %v889_v38 = vpop.f32.mrb[4].mxu0 }
 0x447   : > { %v890_v39 = vadd.f32 %v1054_v37, %v889_v38  ;;  %v1134_v40 = vpop.f32.mrb[5].mxu0 }
 0x448   : > { %v892_v41 = vpop.f32.mrb[6].mxu0 }
 0x449   : > { %895 = vst [vmem:[#allocation12] sm:$0x3] %v890_v39  ;;  %v1135_v42 = vpop.f32.mrb[7].mxu0 }
 0x44a PF: > { %p1171_p2 = scmp.eq.s32.totalorder %s1533_s21, 1  ;;  %s1453_s25 = smov [#allocation12]  }
 0x44b   : > { %s903_s11 = sshll.u32 %s1453_s25, 4  ;;  %s904_s11 = int_to_ptr.vmem [resolvable:$true] %s903_s11 }
 0x44c   : > { %s1362_s26 = scalar_lea.vmem %s904_s11, 32  ;;  %p1369_p10 = scmp.lt.s32.totalorder %s904_s11, %s904_s11 }
 0x44d   : > { %p1363_p13 = scmp.ne.s32.totalorder %s904_s11, %s1362_s26  ;;  %p1370_p7 = scmp.lt.s32.totalorder %s1362_s26, %s1362_s26 }
 0x44f   : > { %p1364_p3 = pnand %p1363_p13, %p1171_p2  ;;  %p1371_p11 = por %p1370_p7, %p1369_p10 }
 0x451   : > { %p1365_p9 = pneg %p1364_p3 }
 0x453   : > { %p1372_p8 = pnand %p1371_p11, %p1365_p9 }
 0x455   : > { %1375 = shalt.err (!%p1372_p8)
}
 0x456   : > { %s1862_s12 = sld [smem:[#allocation22_spill]] }
 0x45c   : > { %s1376_s24 = scalar_lea.hbm %s1862_s12, 32 }
 0x45d   : > { %p1377_p1 = scmp.ne.s32.totalorder %s1862_s12, %s1376_s24  ;;  %p1382_p6 = scmp.lt.u32.totalorder %s1376_s24, %s1862_s12 }
 0x45f   : > { %p1378_p4 = pnand %p1377_p1, %p1171_p2 }
 0x461   : > { %p1379_p5 = pneg %p1378_p4 }
 0x463   : > { %p1384_p12 = pnand %p1382_p6, %p1379_p5 }
 0x465   : > { %1387 = shalt.err (!%p1384_p12)
}
 0x466   : > { %1149 = dma.vmem_to_hbm [thread:$0]  (%p1171_p2), %s904_s11, 32, %s1862_s12, [#allocation6]  }
 0x467   : > { %1421 = dma.done.wait (%p1171_p2), [#allocation6], 32  }
 0x468   : > { %1423 = vsyncadd (%p1171_p2), [#allocation6], 4294967264 }
 0x469 PF: > { %s1863_s15 = sld [smem:[#allocation18_spill]]  ;;  %s1864_s19 = sld [smem:[#allocation19_spill]] }
 0x46a   : > { %p26_p0 = scmp.ge.s32.totalorder %s1608_s30, 4   ;;  %s1865_s17 = smov %s1430_s18 }
 0x46b   : > { %s1867_s20 = smov %s1608_s30 }
 0x46c   :  { %28 = sbr.rel (!%p26_p0) target bundleno = 11 (0xb), region = 136 }
 0x46f   : > { %s1866_s18 = smov %s1863_s15 }
 0x473   :  { %916 = vsyncpa [#allocation5], 1 }
 0x474   :  { %918 = vsyncpa [#allocation5 + $0x1], 1 }
 0x475   :  { %919 = vsyncpa [#allocation8], 1 }
 0x476   :  { %921 = vsyncpa [#allocation8 + $0x1], 1 }
 0x477   :  { %922 = vsyncpa [#allocation11], 1 }
 0x478   :  { %923 = vsyncpa [#allocation6], 1 }
 0x479   :  { %925 = vsyncpa [#allocation6 + $0x1], 1 }

</bundles_post_ra>
